<compile_context>
chip_gen: v7x
topology: tpu7x:2x2x1
jax: 0.10.0
libtpu: 0.0.40
codegen_flags: <defaults>
</compile_context>

<pallas_src>
import jax
import jax.numpy as jnp
from jax.experimental import pallas as pl
from jax.experimental.pallas import tpu as pltpu


def _ffn_kernel(x_ref, w1_ref, s1_ref, b1_ref, w2_ref, s2_ref, b2_ref, o_ref):
    # x_ref : (Cin, tp)    pixel tile, pixels on the lane axis
    # w1_ref: (C2, Cin)    bf16 conv1 weight^T
    # s1_ref: (C2, 1)      f32 BN1 scale      b1_ref: (C2, 1)   f32 BN1 bias
    # w2_ref: (Cout, C2)   bf16 conv2 weight^T
    # s2_ref: (Cout, 1)    f32 BN2 scale      b2_ref: (Cout, 1) f32 BN2 bias
    # o_ref : (Cout, tp)
    x = x_ref[...]
    x_bf = x.astype(jnp.bfloat16)

    # ConvBnAct: 1x1 conv (MXU, bf16 operands, f32 accum) -> BN scale/bias -> ReLU
    h = jnp.dot(w1_ref[...], x_bf, preferred_element_type=jnp.float32)
    h = jnp.maximum(h * s1_ref[...] + b1_ref[...], 0.0)

    # ConvBn: 1x1 conv -> BN scale/bias
    y = jnp.dot(w2_ref[...], h.astype(jnp.bfloat16),
                preferred_element_type=jnp.float32)
    y = y * s2_ref[...] + b2_ref[...]

    # residual add in f32 (in_channels == out_channels)
    o_ref[...] = (y + x.astype(jnp.float32)).astype(o_ref.dtype)


def _round_up(v, m):
    return (v + m - 1) // m * m


def _round_down(v, m):
    return (v // m) * m


def _vmem_capacity_bytes():
    try:
        info = pltpu.get_tpu_info()
        cap = getattr(info, "vmem_capacity_bytes", None)
        if cap:
            return int(cap)
    except Exception:
        pass
    return 64 * 1024 * 1024   # conservative default (v7x per-core VMEM)


def ffn_pallas(x_nchw, w1, s1, b1, w2, s2, b2, *, tile_cap=32768):
    """x_nchw: (N, Cin, H, W). w1: (Cin, 2*Cout). w2: (2*Cout, Cout).
    s*/b*: inference-mode BatchNorm per-channel scale/bias."""
    N, Cin, H, W = x_nchw.shape
    C2 = w1.shape[1]
    Cout = w2.shape[1]
    assert Cin == Cout, "residual connection requires in_channels == out_channels"

    HW = H * W
    x3 = x_nchw.reshape(N, Cin, HW)          # NCHW consumed directly, no transpose/pad

    xb = jnp.dtype(x_nchw.dtype).itemsize
    ob = xb

    # Per-lane VMEM bytes of one grid step: double-buffered in/out tiles,
    # bf16 copies of matmul operands, f32 intermediates h and y.
    per_lane = (2 * Cin * xb + 2 * Cout * ob        # pipelined in/out tiles
                + Cin * 2                           # x bf16 copy
                + C2 * (4 + 2)                      # h f32 + h bf16
                + Cout * 4)                         # y f32
    wbytes = (C2 * Cin + Cout * C2) * 2 * 2 + (C2 + Cout) * 2 * 4 * 2

    vmem_cap = _vmem_capacity_bytes()
    budget = min(vmem_cap // 4, 32 * 1024 * 1024)   # tile byte budget
    tp_budget = max(128, min(int(tile_cap), _round_down(budget // per_lane, 128)))

    if HW <= tp_budget:
        tp = HW                                     # full last dim as one block
    else:
        tp = tp_budget                              # multiple of 128; ragged tail masked
    n_pt = pl.cdiv(HW, tp)

    # v7x megacore: make sure there are >=2 parallel grid steps when possible.
    if N == 1 and n_pt == 1 and HW >= 256:
        tp = _round_up(pl.cdiv(HW, 2), 128)
        n_pt = pl.cdiv(HW, tp)

    grid = (N, n_pt)

    # Transposed conv weights in bf16; BN scale/bias stay f32 (applied post-matmul).
    w1t = w1.T.astype(jnp.bfloat16)                  # (C2, Cin)
    w2t = w2.T.astype(jnp.bfloat16)                  # (Cout, C2)
    s1c = s1.reshape(C2, 1).astype(jnp.float32)
    b1c = b1.reshape(C2, 1).astype(jnp.float32)
    s2c = s2.reshape(Cout, 1).astype(jnp.float32)
    b2c = b2.reshape(Cout, 1).astype(jnp.float32)

    est = per_lane * tp + wbytes
    gen_clamp = max(16 * 1024 * 1024,
                    min(int(0.6 * vmem_cap), 100 * 1024 * 1024))
    vmem_limit = int(min(gen_clamp, max(8 * 1024 * 1024, 2 * est)))

    flops = 2 * N * HW * (Cin * C2 + C2 * Cout)
    bytes_accessed = N * HW * (Cin * xb + Cout * ob) + wbytes

    out3 = pl.pallas_call(
        _ffn_kernel,
        out_shape=jax.ShapeDtypeStruct((N, Cout, HW), x_nchw.dtype),
        grid_spec=pltpu.PrefetchScalarGridSpec(
            num_scalar_prefetch=0,
            grid=grid,
            in_specs=[
                pl.BlockSpec((None, Cin, tp), lambda n, p: (n, 0, p)),  # x tile
                pl.BlockSpec((C2, Cin), lambda n, p: (0, 0)),           # w1^T
                pl.BlockSpec((C2, 1), lambda n, p: (0, 0)),             # bn1 scale
                pl.BlockSpec((C2, 1), lambda n, p: (0, 0)),             # bn1 bias
                pl.BlockSpec((Cout, C2), lambda n, p: (0, 0)),          # w2^T
                pl.BlockSpec((Cout, 1), lambda n, p: (0, 0)),           # bn2 scale
                pl.BlockSpec((Cout, 1), lambda n, p: (0, 0)),           # bn2 bias
            ],
            out_specs=pl.BlockSpec((None, Cout, tp), lambda n, p: (n, 0, p)),
        ),
        compiler_params=pltpu.CompilerParams(
            dimension_semantics=("parallel", "parallel"),
            vmem_limit_bytes=vmem_limit),
        cost_estimate=pl.CostEstimate(flops=flops, transcendentals=0,
                                      bytes_accessed=bytes_accessed),
    )(x3, w1t, s1c, b1c, w2t, s2c, b2c)

    return out3.reshape(N, Cout, H, W)       # reshape only, no transpose/slice


def _fold_bn(gamma, beta, mean, var, eps=1e-5):
    scale = gamma / jnp.sqrt(var + eps)
    bias = beta - mean * scale
    return scale, bias


def ffn_reference(x_nchw, w1, s1, b1, w2, s2, b2):
    """Pure-JAX f32 reference of the original module math (NCHW)."""
    N, Cin, H, W = x_nchw.shape
    xf = x_nchw.reshape(N, Cin, H * W).astype(jnp.float32)
    h = jnp.einsum('ic,nim->ncm', w1, xf) * s1[None, :, None] + b1[None, :, None]
    h = jnp.maximum(h, 0.0)
    y = jnp.einsum('co,ncm->nom', w2, h) * s2[None, :, None] + b2[None, :, None] + xf
    return y.reshape(N, -1, H, W).astype(x_nchw.dtype)


if __name__ == "__main__":
    key = jax.random.PRNGKey(0)
    in_channels = 4
    out_channels = 4          # residual add forces in == out
    hidden = out_channels * 2
    N, H, W = 2, 16, 16

    ks = jax.random.split(key, 12)
    x = jax.random.normal(ks[0], (N, in_channels, H, W), dtype=jnp.float32)

    # Conv weights: torch Conv2d weight is (Cout, Cin, 1, 1); as a matmul we use (Cin, Cout).
    w1 = jax.random.normal(ks[1], (in_channels, hidden), dtype=jnp.float32) * 0.1
    w2 = jax.random.normal(ks[2], (hidden, out_channels), dtype=jnp.float32) * 0.1

    # BatchNorm (inference-mode) params, folded into per-channel scale/bias.
    g1 = 1.0 + 0.1 * jax.random.normal(ks[3], (hidden,), dtype=jnp.float32)
    be1 = 0.1 * jax.random.normal(ks[4], (hidden,), dtype=jnp.float32)
    m1 = 0.1 * jax.random.normal(ks[5], (hidden,), dtype=jnp.float32)
    v1 = jnp.abs(jax.random.normal(ks[6], (hidden,), dtype=jnp.float32)) + 0.5
    g2 = 1.0 + 0.1 * jax.random.normal(ks[7], (out_channels,), dtype=jnp.float32)
    be2 = 0.1 * jax.random.normal(ks[8], (out_channels,), dtype=jnp.float32)
    m2 = 0.1 * jax.random.normal(ks[9], (out_channels,), dtype=jnp.float32)
    v2 = jnp.abs(jax.random.normal(ks[10], (out_channels,), dtype=jnp.float32)) + 0.5

    s1, b1 = _fold_bn(g1, be1, m1, v1)
    s2, b2 = _fold_bn(g2, be2, m2, v2)

    # Primary check: full-last-dim block path (HW fits the VMEM budget).
    out = jax.block_until_ready(ffn_pallas(x, w1, s1, b1, w2, s2, b2))
    ref = ffn_reference(x, w1, s1, b1, w2, s2, b2)
    assert out.shape == x.shape and out.dtype == x.dtype
    assert jnp.allclose(out, ref, atol=5e-2, rtol=5e-2), "mismatch vs reference"

    # Secondary check: multi-tile pixel grid with a ragged (masked) last block
    # and no wrapper-side padding (tile_cap=128 forces tp=128, HW=324).
    x2 = jax.random.normal(ks[11], (1, in_channels, 18, 18), dtype=jnp.float32)
    out2 = jax.block_until_ready(
        ffn_pallas(x2, w1, s1, b1, w2, s2, b2, tile_cap=128))
    ref2 = ffn_reference(x2, w1, s1, b1, w2, s2, b2)
    assert out2.shape == x2.shape and out2.dtype == x2.dtype
    assert jnp.allclose(out2, ref2, atol=5e-2, rtol=5e-2), "mismatch (ragged tiles)"

    print("KERNEL_OK")
</pallas_src>

<mosaic_0001>
module attributes {stable_mosaic.version = 11 : i64} {
  func.func @_ffn_kernel(%arg0: i32, %arg1: i32, %arg2: memref<1x4x256xf32, #tpu.memory_space<vmem>>, %arg3: memref<8x4xbf16, #tpu.memory_space<vmem>>, %arg4: memref<8x1xf32, #tpu.memory_space<vmem>>, %arg5: memref<8x1xf32, #tpu.memory_space<vmem>>, %arg6: memref<4x8xbf16, #tpu.memory_space<vmem>>, %arg7: memref<4x1xf32, #tpu.memory_space<vmem>>, %arg8: memref<4x1xf32, #tpu.memory_space<vmem>>, %arg9: memref<1x4x256xf32, #tpu.memory_space<vmem>>) attributes {dimension_semantics = [#tpu.dimension_semantics<parallel>, #tpu.dimension_semantics<parallel>], iteration_bounds = array<i64: 2, 1>, scalar_prefetch = 0 : i64, scratch_operands = 0 : i64, tpu.core_type = #tpu.core_type<tc>, window_params = [{transform_indices = @transform_0, window_bounds = array<i64: 1, 4, 256>}, {pipeline_mode = #tpu.pipeline_mode<synchronous>, transform_indices = @transform_1, window_bounds = array<i64: 8, 4>}, {pipeline_mode = #tpu.pipeline_mode<synchronous>, transform_indices = @transform_2, window_bounds = array<i64: 8, 1>}, {pipeline_mode = #tpu.pipeline_mode<synchronous>, transform_indices = @transform_3, window_bounds = array<i64: 8, 1>}, {pipeline_mode = #tpu.pipeline_mode<synchronous>, transform_indices = @transform_4, window_bounds = array<i64: 4, 8>}, {pipeline_mode = #tpu.pipeline_mode<synchronous>, transform_indices = @transform_5, window_bounds = array<i64: 4, 1>}, {pipeline_mode = #tpu.pipeline_mode<synchronous>, transform_indices = @transform_6, window_bounds = array<i64: 4, 1>}, {transform_indices = @transform_7, window_bounds = array<i64: 1, 4, 256>}]} {
    %c0 = arith.constant 0 : index
    %c0_0 = arith.constant 0 : index
    %c0_1 = arith.constant 0 : index
    %0 = vector.load %arg2[%c0, %c0_0, %c0_1] : memref<1x4x256xf32, #tpu.memory_space<vmem>>, vector<1x4x256xf32>
    %1 = vector.shape_cast %0 : vector<1x4x256xf32> to vector<4x256xf32>
    %2 = arith.truncf %1 : vector<4x256xf32> to vector<4x256xbf16>
    %c0_2 = arith.constant 0 : index
    %c0_3 = arith.constant 0 : index
    %3 = vector.load %arg3[%c0_2, %c0_3] : memref<8x4xbf16, #tpu.memory_space<vmem>>, vector<8x4xbf16>
    %cst = arith.constant dense<0.000000e+00> : vector<8x256xf32>
    %4 = tpu.matmul %3, %2, %cst {dimension_numbers = #tpu.dot_dimension_numbers<[1], [0], [0], [1], [0, 0, 1, 1], [], []>} : vector<8x4xbf16>, vector<4x256xbf16>, vector<8x256xf32> -> vector<8x256xf32>
    %c0_4 = arith.constant 0 : index
    %c0_5 = arith.constant 0 : index
    %5 = vector.load %arg4[%c0_4, %c0_5] : memref<8x1xf32, #tpu.memory_space<vmem>>, vector<8x1xf32>
    %6 = vector.broadcast %5 : vector<8x1xf32> to vector<8x256xf32>
    %7 = arith.mulf %4, %6 : vector<8x256xf32>
    %c0_6 = arith.constant 0 : index
    %c0_7 = arith.constant 0 : index
    %8 = vector.load %arg5[%c0_6, %c0_7] : memref<8x1xf32, #tpu.memory_space<vmem>>, vector<8x1xf32>
    %9 = vector.broadcast %8 : vector<8x1xf32> to vector<8x256xf32>
    %10 = arith.addf %7, %9 : vector<8x256xf32>
    %cst_8 = arith.constant 0.000000e+00 : f32
    %11 = vector.broadcast %cst_8 : f32 to vector<8x256xf32>
    %12 = arith.maximumf %10, %11 : vector<8x256xf32>
    %c0_9 = arith.constant 0 : index
    %c0_10 = arith.constant 0 : index
    %13 = vector.load %arg6[%c0_9, %c0_10] : memref<4x8xbf16, #tpu.memory_space<vmem>>, vector<4x8xbf16>
    %14 = arith.truncf %12 : vector<8x256xf32> to vector<8x256xbf16>
    %cst_11 = arith.constant dense<0.000000e+00> : vector<4x256xf32>
    %15 = tpu.matmul %13, %14, %cst_11 {dimension_numbers = #tpu.dot_dimension_numbers<[1], [0], [0], [1], [0, 0, 1, 1], [], []>} : vector<4x8xbf16>, vector<8x256xbf16>, vector<4x256xf32> -> vector<4x256xf32>
    %c0_12 = arith.constant 0 : index
    %c0_13 = arith.constant 0 : index
    %16 = vector.load %arg7[%c0_12, %c0_13] : memref<4x1xf32, #tpu.memory_space<vmem>>, vector<4x1xf32>
    %17 = vector.broadcast %16 : vector<4x1xf32> to vector<4x256xf32>
    %18 = arith.mulf %15, %17 : vector<4x256xf32>
    %c0_14 = arith.constant 0 : index
    %c0_15 = arith.constant 0 : index
    %19 = vector.load %arg8[%c0_14, %c0_15] : memref<4x1xf32, #tpu.memory_space<vmem>>, vector<4x1xf32>
    %20 = vector.broadcast %19 : vector<4x1xf32> to vector<4x256xf32>
    %21 = arith.addf %18, %20 : vector<4x256xf32>
    %22 = arith.addf %21, %1 : vector<4x256xf32>
    %c0_16 = arith.constant 0 : index
    %c0_17 = arith.constant 0 : index
    %c0_18 = arith.constant 0 : index
    %23 = vector.load %arg9[%c0_16, %c0_17, %c0_18] : memref<1x4x256xf32, #tpu.memory_space<vmem>>, vector<1x4x256xf32>
    %24 = vector.shape_cast %23 : vector<1x4x256xf32> to vector<4x256xf32>
    %25 = vector.shape_cast %22 : vector<4x256xf32> to vector<1x4x256xf32>
    tpu.vector_store %arg9[%c0_16, %c0_17, %c0_18], %25 {strides = array<i32>} : memref<1x4x256xf32, #tpu.memory_space<vmem>>, vector<1x4x256xf32>,
    return
  }
  func.func @transform_0(%arg0: i32, %arg1: i32) -> (i32, i32, i32) {
    %c0_i32 = arith.constant 0 : i32
    %c0_i32_0 = arith.constant 0 : i32
    return %arg0, %c0_i32, %arg1 : i32, i32, i32
  }
  func.func @transform_1(%arg0: i32, %arg1: i32) -> (i32, i32) {
    %c0_i32 = arith.constant 0 : i32
    %c0_i32_0 = arith.constant 0 : i32
    %c0_i32_1 = arith.constant 0 : i32
    return %c0_i32, %c0_i32_0 : i32, i32
  }
  func.func @transform_2(%arg0: i32, %arg1: i32) -> (i32, i32) {
    %c0_i32 = arith.constant 0 : i32
    %c0_i32_0 = arith.constant 0 : i32
    %c0_i32_1 = arith.constant 0 : i32
    return %c0_i32, %c0_i32_0 : i32, i32
  }
  func.func @transform_3(%arg0: i32, %arg1: i32) -> (i32, i32) {
    %c0_i32 = arith.constant 0 : i32
    %c0_i32_0 = arith.constant 0 : i32
    %c0_i32_1 = arith.constant 0 : i32
    return %c0_i32, %c0_i32_0 : i32, i32
  }
  func.func @transform_4(%arg0: i32, %arg1: i32) -> (i32, i32) {
    %c0_i32 = arith.constant 0 : i32
    %c0_i32_0 = arith.constant 0 : i32
    %c0_i32_1 = arith.constant 0 : i32
    return %c0_i32, %c0_i32_0 : i32, i32
  }
  func.func @transform_5(%arg0: i32, %arg1: i32) -> (i32, i32) {
    %c0_i32 = arith.constant 0 : i32
    %c0_i32_0 = arith.constant 0 : i32
    %c0_i32_1 = arith.constant 0 : i32
    return %c0_i32, %c0_i32_0 : i32, i32
  }
  func.func @transform_6(%arg0: i32, %arg1: i32) -> (i32, i32) {
    %c0_i32 = arith.constant 0 : i32
    %c0_i32_0 = arith.constant 0 : i32
    %c0_i32_1 = arith.constant 0 : i32
    return %c0_i32, %c0_i32_0 : i32, i32
  }
  func.func @transform_7(%arg0: i32, %arg1: i32) -> (i32, i32, i32) {
    %c0_i32 = arith.constant 0 : i32
    %c0_i32_0 = arith.constant 0 : i32
    return %arg0, %c0_i32, %arg1 : i32, i32, i32
  }
}

</mosaic_0001>

<bundles_post_ra>
// kernel: tpu_custom_call.1
= control target key start
LH: loop header
LB: loop body
LE: loop exit
PB: predicated region body
PF: predicated region fallthrough
CT: control target
= control target key end

     0   :  { %12 = vsyncpa [#allocation3], 0  ;;  %s887_s0 = inlined_call_operand.vmem [shape: f32[2,4,256], index: 0, kind: input, shape index: {}]   ;;  %s888_s1 = inlined_call_operand.vmem [shape: bf16[8,4], index: 1, kind: input, shape index: {}]   ;;  %s889_s2 = inlined_call_operand.vmem [shape: f32[8,1], index: 2, kind: input, shape index: {}]   ;;  %s890_s3 = inlined_call_operand.vmem [shape: f32[8,1], index: 3, kind: input, shape index: {}]   ;;  %s891_s4 = inlined_call_operand.vmem [shape: bf16[4,8], index: 4, kind: input, shape index: {}]   ;;  %s892_s5 = inlined_call_operand.vmem [shape: f32[4,1], index: 5, kind: input, shape index: {}]   ;;  %s893_s6 = inlined_call_operand.vmem [shape: f32[4,1], index: 6, kind: input, shape index: {}]   ;;  %s894_s7 = inlined_call_operand.hbm [shape: f32[2,4,256], index: 7, kind: output, shape index: {}]  }
   0x1   :  { %14 = vsyncpa [#allocation3 + $0x1], 0  ;;  %s757_s24 = smov 0   ;;  %s759_s25 = smov 0  }
   0x2   :  { %s761_s26 = smov 0   ;;  %s763_s27 = smov 0  }
   0x3   :  { %s765_s28 = smov 0   ;;  %s767_s29 = smov 0  }
   0x4 LB: > { %s557_s30 = sadd.s32 4294967295, %s713_s29   ;;  %s558_s8 = sadd.s32 4294967294, %s713_s29   ;;  %s713_s29 = sphi %s767_s29, %s20_s29   ;;  %s709_s28 = sphi %s765_s28, %s901_s28   ;;  %s705_s27 = sphi %s763_s27, %s900_s27   ;;  %s701_s26 = sphi %s761_s26, %s899_s26   ;;  %s697_s25 = sphi %s759_s25, %s898_s25   ;;  %s693_s24 = sphi %s757_s24, %s897_s24  }
   0x5   : > { %s32_s9 = sadd.s32 1, %s709_s28  ;;  %s195_s10 = sadd.s32 1, %s701_s26 }
   0x6   : > { %p34_p0 = scmp.ge.s32.totalorder %s32_s9, 2  ;;  %p205_p1 = scmp.ne.s32.totalorder %s701_s26, %s697_s25 }
   0x7   : > { %p206_p2 = scmp.eq.s32.totalorder %s557_s30, 1  ;;  %p211_p3 = scmp.ne.s32.totalorder %s697_s25, %s693_s24 }
   0x8   : > { %s903_s9 = smov (%p34_p0, %s32_s9), 0  ;;  %p212_p5 = scmp.eq.s32.totalorder %s558_s8, 1 }
   0x9   : > { %p797_p4 = por %p206_p2, %p205_p1  ;;  %s190_s12 = ssub.s32 %s709_s28, %s903_s9 }
   0xa   : > { %p561_p6 = scmp.ge.s32.totalorder %s713_s29, 1  ;;  %p193_p7 = scmp.eq.s32.totalorder %s190_s12, 0 }
   0xb   : > { %p804_p8 = por %p212_p5, %p211_p3  ;;  %p261_p9 = scmp.lt.s32.totalorder %s713_s29, 3 }
   0xc   : > { %s810_s14 = scalar_select %p193_p7, %s701_s26, %s195_s10  }
   0xd   : > { %p262_p10 = pnand %p561_p6, %p261_p9 }
   0xe   : > { %p298_p11 = scmp.lt.s32.totalorder (!%p262_p10), %s705_s27, 1  ;;  %v715_v0 = vmov (!%p262_p10), 0   ;;  %v368_v1 = vld [vmem:[%s889_s2] sm:$0xff] (!%p262_p10)  ;;  %vm320_vm0 = vcmask (!%p262_p10), 1041408   ;;  %vm316_vm1 = vcmask (!%p262_p10), 31744   ;;  %vm393_vm2 = vcmask (!%p262_p10), 1043456  }
   0xf   : > { %265 = sbr.rel (%p262_p10) target bundleno = 495 (0x1ef), region = 48  ;;  %359 = vmatprep.mubr.bf16.mxu0 (!%p262_p10), %v715_v0  ;;  %632 = vset.pattern.permute.xlu0 (!%p262_p10), %v715_v0  ;;  %v376_v2 = vld [vmem:[%s890_s3] sm:$0xff] (!%p262_p10)  ;;  %vm389_vm3 = vcmask (!%p262_p10), 64512   ;;  %s294_s19 = sand.u32 (!%p262_p10), 1, %s697_s25  }
  0x10   : > { %371 = vperm.xlu0 (!%p262_p10), %632, %v368_v1   ;;  %432 = vmatprep.mubr.bf16.mxu1 (!%p262_p10), %v715_v0  ;;  %v315_v8 = vld [vmem:[%s888_s1] sm:$0xf] (!%p262_p10)  ;;  %s575_s21 = sshll.u32 (!%p262_p10), %s705_s27, 7  ;;  %s465_s12 = scalar_lea.sflag (!%p262_p10), [#allocation3], %s294_s19 }
  0x11   : > { %633 = vset.pattern.permute.xlu1 (!%p262_p10), %v715_v0  ;;  %v441_v9 = vld [vmem:[%s892_s5] sm:$0xf] (!%p262_p10)  ;;  %s840_s10 = scalar_lea.hbm (!%p262_p10), %s894_s7, %s575_s21 }
  0x12   : > { %444 = vperm.xlu1 (!%p262_p10), %633, %v441_v9   ;;  %v449_v10 = vld [vmem:[%s893_s6] sm:$0xf] (!%p262_p10) }
  0x13   : > { %v386_v26 = vld [vmem:[%s891_s4] sm:$0x3] (!%p262_p10) }
  0x14   : > { %379 = vperm.xlu0 (!%p262_p10), %632, %v376_v2  }
  0x16   : > { %s299_s17 = scalar_select %p298_p11, %s705_s27, 1  ;;  %452 = vperm.xlu1 %633, %v449_v10  }
  0x17   : > { %s716_s27 = smov [#allocation2]  }
  0x18   : > { %s574_s20 = sshll.u32 %s299_s17, 3  ;;  %s639_s16 = sshll.u32 %s716_s27, 4  ;;  %s640_s16 = int_to_ptr.vmem [resolvable:$false] %s639_s16 }
  0x19   : > { %s305_s23 = scalar_lea.vmem %s887_s0, %s574_s20  ;;  %s562_s20 = sshll.u32 %s294_s19, 3 }
  0x1a   : > { %v309_v3 = vld [vmem:[%s305_s23] sm:$0xff]  ;;  %s296_s22 = scalar_lea.vmem [#allocation2], %s562_s20  ;;  %s641_s17 = scalar_lea.vmem %s640_s16, 256 }
  0x1b   : > { %v311_v4 = vcombine.high %v309_v3, %v309_v3  ;;  %v313_v5 = vpack.c.bf16 %v309_v3, %v309_v3  ;;  %s481_s23 = sshll.u32 %s296_s22, 4  ;;  %s842_s23 = int_to_ptr.vmem [resolvable:$true] %s481_s23 }
  0x1c   : > { %s635_s15 = scalar_lea.vmem %s842_s23, 128  ;;  %p642_p1 = scmp.lt.s32.totalorder %s842_s23, %s640_s16 }
  0x1d   : > { %v314_v6 = vpack.c.bf16 %v311_v4, %v311_v4  ;;  %v322_v7 = vsel %vm320_vm0, %v313_v5, 0  ;;  %p636_p12 = scmp.ne.s32.totalorder %s842_s23, %s635_s15  ;;  %p643_p2 = scmp.lt.s32.totalorder %s641_s17, %s635_s15 }
  0x1f   : > { %565 = vmatprep.subr.msk.bf16.mxu0 %vm320_vm0, %v314_v6  ;;  %p637_p13 = pnand %p636_p12, %p797_p4  ;;  %p644_p3 = por %p643_p2, %p642_p1 }
  0x20   : > { %328 = vmatpush1.bf16.msra.mxu0 %v322_v7 }
  0x21   : > { %p638_p0 = pneg %p637_p13 }
  0x23   : > { %566 = vmatmul.mubr.msk.bf16.vlgmr.msra.gmra.mrb[0].mxu0 %vm316_vm1, %v315_v8  ;;  %p645_p5 = pnand %p644_p3, %p638_p0 }
  0x8f   : > { %v372_v11 = vpop.permute.xlu0 %371 }
  0x91   : > { %v445_v27 = vpop.permute.xlu1 %444 }
  0x93   : > { %v380_v15 = vpop.permute.xlu0 %379 }
  0x95   : > { %v453_v31 = vpop.permute.xlu1 %452 }
  0xf6   : > { %v361_v12 = vpop.f32.mrb[0].mxu0 }
  0xf7   : > { %v374_v13 = vmul.f32 %v372_v11, %v361_v12  ;;  %v363_v14 = vpop.f32.mrb[1].mxu0 }
  0xf8   : > { %v375_v16 = vmul.f32 %v372_v11, %v363_v14  ;;  %v365_v17 = vpop.f32.mrb[2].mxu0 }
  0xf9   : > { %v382_v18 = vadd.f32 %v380_v15, %v374_v13  ;;  %v366_v19 = vpop.f32.mrb[3].mxu0 }
  0xfa   : > { %v383_v20 = vadd.f32 %v380_v15, %v375_v16 }
  0xfb   : > { %v384_v21 = vmax.f32 %v382_v18, 0.0 }
  0xfc   : > { %v385_v22 = vmax.f32 %v383_v20, 0.0 }
  0xfd   : > { %v387_v23 = vpack.c.bf16 %v384_v21, %v384_v21 }
  0xfe   : > { %v388_v24 = vpack.c.bf16 %v385_v22, %v385_v22 }
  0xff   : > { %v395_v25 = vsel %vm393_vm2, %v387_v23, 0 }
 0x100   : > { %567 = vmatprep.subr.msk.bf16.mxu1 %vm393_vm2, %v388_v24 }
 0x101   : > { %401 = vmatpush1.bf16.msra.mxu1 %v395_v25 }
 0x104   : > { %568 = vmatmul.mubr.msk.bf16.vlgmr.msra.gmra.mrb[0].mxu1 %vm389_vm3, %v386_v26 }
 0x1d7   : > { %v434_v28 = vpop.f32.mrb[0].mxu1 }
 0x1d8   : > { %v447_v29 = vmul.f32 %v445_v27, %v434_v28  ;;  %v436_v30 = vpop.f32.mrb[1].mxu1 }
 0x1d9   : > { %v448_v32 = vmul.f32 %v445_v27, %v436_v30  ;;  %v438_v33 = vpop.f32.mrb[2].mxu1 }
 0x1da   : > { %v455_v34 = vadd.f32 %v453_v31, %v447_v29  ;;  %v439_v35 = vpop.f32.mrb[3].mxu1 }
 0x1db   : > { %v456_v36 = vadd.f32 %v453_v31, %v448_v32 }
 0x1dc   : > { %v457_v37 = vadd.f32 %v455_v34, %v309_v3 }
 0x1dd   : > { %v458_v38 = vadd.f32 %v456_v36, %v311_v4 }
 0x1df   : > { %v461_v39 = vcombine.low %v457_v37, %v458_v38 }
 0x1e1   : > { %463 = vst [vmem:[%s296_s22] sm:$0xff] %v461_v39 }
 0x1e2   : > { %648 = shalt.err (!%p645_p5)
}
 0x1e3   : > { %s649_s18 = scalar_lea.hbm %s840_s10, 128  ;;  %s653_s21 = scalar_lea.hbm %s894_s7, 256 }
 0x1e4   : > { %p650_p6 = scmp.ne.s32.totalorder %s840_s10, %s649_s18  ;;  %p654_p10 = scmp.lt.u32.totalorder %s840_s10, %s894_s7 }
 0x1e5   : > { %p655_p11 = scmp.lt.u32.totalorder %s653_s21, %s649_s18  ;;  %p657_p13 = scmp.lt.u32.totalorder %s649_s18, %s840_s10 }
 0x1e6   : > { %p651_p7 = pnand %p650_p6, %p797_p4 }
 0x1e7   : > { %p656_p12 = por %p655_p11, %p654_p10 }
 0x1e8   : > { %p652_p9 = pneg %p651_p7 }
 0x1e9   : > { %p658_p0 = por %p657_p13, %p656_p12 }
 0x1eb   : > { %p659_p1 = pnand %p658_p0, %p652_p9 }
 0x1ed   : > { %662 = shalt.err (!%p659_p1)
}
 0x1ee   : > { %576 = dma.vmem_to_hbm [thread:$0]  (%p797_p4), %s842_s23, 128, %s840_s10, %s465_s12  }
 0x1ef PF: > { %p582_p2 = scmp.ge.s32.totalorder %s713_s29, 2  ;;  %s493_s8 = sand.u32 1, %s693_s24  }
 0x1f0   : > { %s494_s15 = scalar_lea.sflag [#allocation3], %s493_s8 }
 0x1f1   : > { %p579_p3 = pnand %p582_p2, %p804_p8 }
 0x1f3   : > { %688 = dma.done.wait (!%p579_p3), %s494_s15, 128  }
 0x1f4   : > { %690 = vsyncadd (!%p579_p3), %s494_s15, 4294967168  ;;  %s20_s29 = sadd.s32 1, %s713_s29   ;;  %s897_s24 = smov %s697_s25 }
 0x1f5   : > { %p17_p5 = scmp.ge.s32.totalorder %s20_s29, 4   ;;  %s898_s25 = smov %s701_s26 }
 0x1f6   : > { %s899_s26 = smov %s810_s14  ;;  %s900_s27 = smov %s709_s28 }
 0x1f7   : > { %s901_s28 = smov %s903_s9  ;;  %19 = sbr.rel (!%p17_p5) target bundleno = 4 (0x4), region = 83 }
 0x1fe   :  { %499 = vsyncpa [#allocation3], 1 }
 0x1ff   :  { %501 = vsyncpa [#allocation3 + $0x1], 1 }

</bundles_post_ra>
